<compile_context>
chip_gen: v5e
topology: v5e:2x2
jax: 0.10.0
libtpu: 0.0.40
codegen_flags: <defaults>
</compile_context>

<pallas_src>
import jax
import jax.numpy as jnp
from jax.experimental import pallas as pl
from jax.experimental.pallas import tpu as pltpu


def _round_up(x, m):
    return ((x + m - 1) // m) * m


# --------------------------------------------------------------------------
# Kernels
# --------------------------------------------------------------------------
def _block_kernel_proj(x_ref, w0_ref, b0_ref, w1_ref, b1_ref, ws_ref, out_ref):
    x = x_ref[...]                                     # native dtype, no up-cast
    h = jnp.maximum(x, jnp.zeros((), x.dtype))         # relu(x)  (VPU)
    net = jnp.dot(h, w0_ref[...],
                  preferred_element_type=jnp.float32) + b0_ref[...]
    net = jnp.maximum(net, 0.0).astype(w1_ref.dtype)   # relu(net), MXU dtype
    dx = jnp.dot(net, w1_ref[...],
                 preferred_element_type=jnp.float32) + b1_ref[...]
    x_s = jnp.dot(x, ws_ref[...], preferred_element_type=jnp.float32)
    out_ref[...] = (x_s + dx).astype(out_ref.dtype)


def _block_kernel_identity(x_ref, w0_ref, b0_ref, w1_ref, b1_ref, out_ref):
    x = x_ref[...]
    h = jnp.maximum(x, jnp.zeros((), x.dtype))
    net = jnp.dot(h, w0_ref[...],
                  preferred_element_type=jnp.float32) + b0_ref[...]
    net = jnp.maximum(net, 0.0).astype(w1_ref.dtype)
    dx = jnp.dot(net, w1_ref[...],
                 preferred_element_type=jnp.float32) + b1_ref[...]
    out_ref[...] = (x.astype(jnp.float32) + dx).astype(out_ref.dtype)  # VPU add


# --------------------------------------------------------------------------
# Wrapper
# --------------------------------------------------------------------------
def resnet_block_fc(x, params, *, tm=512, vmem_limit_bytes=None):
    """x: [..., size_in] -> [..., size_out].

    params = (w0, b0, w1, b1, ws)
      w0: [size_in, size_h]   (fc_0 weight, already transposed to [in, out])
      b0: [1, size_h]
      w1: [size_h, size_out]  (fc_1 weight, transposed; zero-init per module)
      b1: [1, size_out]
      ws: [size_in, size_out] shortcut weight, or None when size_in == size_out
    """
    w0, b0, w1, b1, ws = params
    size_in = x.shape[-1]
    size_h = w0.shape[1]
    size_out = w1.shape[1]
    lead = x.shape[:-1]
    n = 1
    for d in lead:
        n *= d
    x2 = x.reshape(n, size_in)
    identity = ws is None

    # Lane-dense feature padding (multiples of 128); zero padding is inert.
    in_p = _round_up(size_in, 128)
    h_p = _round_up(size_h, 128)
    out_p = _round_up(size_out, 128)

    x_itemsize = jnp.dtype(x.dtype).itemsize
    w_itemsize = jnp.dtype(w0.dtype).itemsize

    # ---- pick a row tile that fits VMEM (weights resident + 2x double-
    # ---- buffered x/out tiles + f32 live intermediates), with headroom ----
    weight_bytes = (in_p * h_p + h_p * out_p + h_p + out_p) * w_itemsize
    if not identity:
        weight_bytes += in_p * out_p * w_itemsize
    vmem_budget = 96 * 1024 * 1024          # stay well under 128 MiB (64 on v7x)
    per_row_bytes = (
        2 * (in_p + out_p) * x_itemsize                 # double-buffered x/out
        + (in_p + 2 * h_p + 2 * out_p) * 4              # f32 intermediates
    )
    tm_cap = max(8, (vmem_budget - weight_bytes) // max(per_row_bytes, 1))
    tm_eff = max(8, min(_round_up(tm, 8), (tm_cap // 8) * 8))
    tm_eff = min(tm_eff, _round_up(max(n, 1), 8))       # don't exceed the data
    n_p = _round_up(max(n, 1), tm_eff)
    grid = (n_p // tm_eff,)

    # ---- zero padding (pure pads; XLA handles them cheaply) ----
    x_pad = jnp.pad(x2, ((0, n_p - n), (0, in_p - size_in)))
    w0_p = jnp.pad(w0, ((0, in_p - size_in), (0, h_p - size_h)))
    b0_p = jnp.pad(b0, ((0, 0), (0, h_p - size_h)))
    w1_p = jnp.pad(w1, ((0, h_p - size_h), (0, out_p - size_out)))
    b1_p = jnp.pad(b1, ((0, 0), (0, out_p - size_out)))

    # ---- cost estimate for XLA scheduling around the custom call ----
    flops = 2 * n_p * (in_p * h_p + h_p * out_p)
    bytes_accessed = (
        n_p * (in_p + out_p) * x_itemsize + weight_bytes
    )
    if not identity:
        flops += 2 * n_p * in_p * out_p
    cost = pl.CostEstimate(flops=flops, transcendentals=0,
                           bytes_accessed=bytes_accessed)

    if vmem_limit_bytes is None:
        est = weight_bytes + tm_eff * per_row_bytes
        vmem_limit_bytes = min(int(est * 1.5) + (4 << 20), 100 * 1024 * 1024)
    compiler_params = pltpu.CompilerParams(
        dimension_semantics=("parallel",),
        vmem_limit_bytes=vmem_limit_bytes,
    )

    x_spec = pl.BlockSpec((tm_eff, in_p), lambda i: (i, 0))
    w0_spec = pl.BlockSpec((in_p, h_p), lambda i: (0, 0))
    b0_spec = pl.BlockSpec((1, h_p), lambda i: (0, 0))
    w1_spec = pl.BlockSpec((h_p, out_p), lambda i: (0, 0))
    b1_spec = pl.BlockSpec((1, out_p), lambda i: (0, 0))
    out_spec = pl.BlockSpec((tm_eff, out_p), lambda i: (i, 0))

    if identity:
        kernel = _block_kernel_identity
        in_specs = [x_spec, w0_spec, b0_spec, w1_spec, b1_spec]
        operands = (x_pad, w0_p, b0_p, w1_p, b1_p)
    else:
        ws_p = jnp.pad(ws, ((0, in_p - size_in), (0, out_p - size_out)))
        kernel = _block_kernel_proj
        ws_spec = pl.BlockSpec((in_p, out_p), lambda i: (0, 0))
        in_specs = [x_spec, w0_spec, b0_spec, w1_spec, b1_spec, ws_spec]
        operands = (x_pad, w0_p, b0_p, w1_p, b1_p, ws_p)

    out_pad = pl.pallas_call(
        kernel,
        out_shape=jax.ShapeDtypeStruct((n_p, out_p), x.dtype),
        grid=grid,
        in_specs=in_specs,
        out_specs=out_spec,
        compiler_params=compiler_params,
        cost_estimate=cost,
    )(*operands)

    out2 = out_pad[:n, :size_out]
    return out2.reshape(*lead, size_out)


# --------------------------------------------------------------------------
# Parameter init mirroring ResnetBlockFC.__init__ (shapes + zero fc_1.weight)
# --------------------------------------------------------------------------
def init_params(key, size_in, size_out=None, size_h=None, dtype=jnp.float32):
    if size_out is None:
        size_out = size_in
    if size_h is None:
        size_h = min(size_in, size_out)
    k0, k1, k2, k3 = jax.random.split(key, 4)

    # fc_0: Linear(size_in, size_h); stored transposed [in, out].
    w0 = jax.random.normal(k0, (size_in, size_h), dtype) * 0.1
    b0 = jax.random.normal(k1, (1, size_h), dtype) * 0.1
    # fc_1: Linear(size_h, size_out) with nn.init.zeros_(weight).
    w1 = jnp.zeros((size_h, size_out), dtype)
    b1 = jax.random.normal(k2, (1, size_out), dtype) * 0.1
    # shortcut: None (identity) when size_in == size_out, else bias-free Linear.
    if size_in == size_out:
        ws = None
    else:
        ws = jax.random.normal(k3, (size_in, size_out), dtype) * 0.1
    return (w0, b0, w1, b1, ws)


def _reference(x, params):
    w0, b0, w1, b1, ws = params
    h = jnp.maximum(x, 0.0)
    net = h @ w0 + b0[0]
    dx = jnp.maximum(net, 0.0) @ w1 + b1[0]
    x_s = x if ws is None else x @ ws
    return x_s + dx


if __name__ == "__main__":
    key = jax.random.PRNGKey(0)
    k_x1, k_p1, k_x2, k_p2 = jax.random.split(key, 4)

    # Case 1: projection shortcut (size_in != size_out).
    batch, n_pts, size_in, size_out = 2, 8, 16, 32
    x1 = jax.random.normal(k_x1, (batch, n_pts, size_in), jnp.float32)
    params1 = init_params(k_p1, size_in, size_out)
    out1 = jax.block_until_ready(resnet_block_fc(x1, params1))
    ref1 = _reference(x1.reshape(-1, size_in), params1).reshape(
        batch, n_pts, size_out)
    assert out1.shape == (batch, n_pts, size_out)
    assert jnp.allclose(out1, ref1, atol=1e-5, rtol=1e-5)

    # Case 2: identity shortcut (size_in == size_out) -> VPU-add variant.
    size_eq = 32
    x2 = jax.random.normal(k_x2, (batch, n_pts, size_eq), jnp.float32)
    params2 = init_params(k_p2, size_eq)
    out2 = jax.block_until_ready(resnet_block_fc(x2, params2))
    ref2 = _reference(x2.reshape(-1, size_eq), params2).reshape(
        batch, n_pts, size_eq)
    assert out2.shape == (batch, n_pts, size_eq)
    assert jnp.allclose(out2, ref2, atol=1e-5, rtol=1e-5)

    print("KERNEL_OK")
</pallas_src>

<mosaic_0001>
module attributes {stable_mosaic.version = 11 : i64} {
  func.func @_block_kernel_proj(%arg0: i32, %arg1: memref<16x128xf32, #tpu.memory_space<vmem>>, %arg2: memref<128x128xf32, #tpu.memory_space<vmem>>, %arg3: memref<1x128xf32, #tpu.memory_space<vmem>>, %arg4: memref<128x128xf32, #tpu.memory_space<vmem>>, %arg5: memref<1x128xf32, #tpu.memory_space<vmem>>, %arg6: memref<128x128xf32, #tpu.memory_space<vmem>>, %arg7: memref<16x128xf32, #tpu.memory_space<vmem>>) attributes {dimension_semantics = [#tpu.dimension_semantics<parallel>], iteration_bounds = array<i64: 1>, scalar_prefetch = 0 : i64, scratch_operands = 0 : i64, tpu.core_type = #tpu.core_type<tc>, window_params = [{transform_indices = @transform_0, window_bounds = array<i64: 16, 128>}, {pipeline_mode = #tpu.pipeline_mode<synchronous>, transform_indices = @transform_1, window_bounds = array<i64: 128, 128>}, {pipeline_mode = #tpu.pipeline_mode<synchronous>, transform_indices = @transform_2, window_bounds = array<i64: 1, 128>}, {pipeline_mode = #tpu.pipeline_mode<synchronous>, transform_indices = @transform_3, window_bounds = array<i64: 128, 128>}, {pipeline_mode = #tpu.pipeline_mode<synchronous>, transform_indices = @transform_4, window_bounds = array<i64: 1, 128>}, {pipeline_mode = #tpu.pipeline_mode<synchronous>, transform_indices = @transform_5, window_bounds = array<i64: 128, 128>}, {transform_indices = @transform_6, window_bounds = array<i64: 16, 128>}]} {
    %c0 = arith.constant 0 : index
    %c0_0 = arith.constant 0 : index
    %0 = vector.load %arg1[%c0, %c0_0] : memref<16x128xf32, #tpu.memory_space<vmem>>, vector<16x128xf32>
    %cst = arith.constant 0.000000e+00 : f32
    %1 = vector.broadcast %cst : f32 to vector<16x128xf32>
    %2 = arith.maximumf %0, %1 : vector<16x128xf32>
    %c0_1 = arith.constant 0 : index
    %c0_2 = arith.constant 0 : index
    %3 = vector.load %arg2[%c0_1, %c0_2] : memref<128x128xf32, #tpu.memory_space<vmem>>, vector<128x128xf32>
    %cst_3 = arith.constant dense<0.000000e+00> : vector<16x128xf32>
    %4 = tpu.matmul %2, %3, %cst_3 {dimension_numbers = #tpu.dot_dimension_numbers<[1], [0], [0], [1], [0, 0, 1, 1], [], []>} : vector<16x128xf32>, vector<128x128xf32>, vector<16x128xf32> -> vector<16x128xf32>
    %c0_4 = arith.constant 0 : index
    %c0_5 = arith.constant 0 : index
    %5 = vector.load %arg3[%c0_4, %c0_5] : memref<1x128xf32, #tpu.memory_space<vmem>>, vector<1x128xf32>
    %6 = vector.broadcast %5 : vector<1x128xf32> to vector<16x128xf32>
    %7 = arith.addf %4, %6 : vector<16x128xf32>
    %cst_6 = arith.constant 0.000000e+00 : f32
    %8 = vector.broadcast %cst_6 : f32 to vector<16x128xf32>
    %9 = arith.maximumf %7, %8 : vector<16x128xf32>
    %c0_7 = arith.constant 0 : index
    %c0_8 = arith.constant 0 : index
    %10 = vector.load %arg4[%c0_7, %c0_8] : memref<128x128xf32, #tpu.memory_space<vmem>>, vector<128x128xf32>
    %cst_9 = arith.constant dense<0.000000e+00> : vector<16x128xf32>
    %11 = tpu.matmul %9, %10, %cst_9 {dimension_numbers = #tpu.dot_dimension_numbers<[1], [0], [0], [1], [0, 0, 1, 1], [], []>} : vector<16x128xf32>, vector<128x128xf32>, vector<16x128xf32> -> vector<16x128xf32>
    %c0_10 = arith.constant 0 : index
    %c0_11 = arith.constant 0 : index
    %12 = vector.load %arg5[%c0_10, %c0_11] : memref<1x128xf32, #tpu.memory_space<vmem>>, vector<1x128xf32>
    %13 = vector.broadcast %12 : vector<1x128xf32> to vector<16x128xf32>
    %14 = arith.addf %11, %13 : vector<16x128xf32>
    %c0_12 = arith.constant 0 : index
    %c0_13 = arith.constant 0 : index
    %15 = vector.load %arg6[%c0_12, %c0_13] : memref<128x128xf32, #tpu.memory_space<vmem>>, vector<128x128xf32>
    %cst_14 = arith.constant dense<0.000000e+00> : vector<16x128xf32>
    %16 = tpu.matmul %0, %15, %cst_14 {dimension_numbers = #tpu.dot_dimension_numbers<[1], [0], [0], [1], [0, 0, 1, 1], [], []>} : vector<16x128xf32>, vector<128x128xf32>, vector<16x128xf32> -> vector<16x128xf32>
    %17 = arith.addf %16, %14 : vector<16x128xf32>
    %c0_15 = arith.constant 0 : index
    %c0_16 = arith.constant 0 : index
    %18 = vector.load %arg7[%c0_15, %c0_16] : memref<16x128xf32, #tpu.memory_space<vmem>>, vector<16x128xf32>
    tpu.vector_store %arg7[%c0_15, %c0_16], %17 {strides = array<i32>} : memref<16x128xf32, #tpu.memory_space<vmem>>, vector<16x128xf32>,
    return
  }
  func.func @transform_0(%arg0: i32) -> (i32, i32) {
    %c0_i32 = arith.constant 0 : i32
    %c0_i32_0 = arith.constant 0 : i32
    return %arg0, %c0_i32 : i32, i32
  }
  func.func @transform_1(%arg0: i32) -> (i32, i32) {
    %c0_i32 = arith.constant 0 : i32
    %c0_i32_0 = arith.constant 0 : i32
    %c0_i32_1 = arith.constant 0 : i32
    return %c0_i32, %c0_i32_0 : i32, i32
  }
  func.func @transform_2(%arg0: i32) -> (i32, i32) {
    %c0_i32 = arith.constant 0 : i32
    %c0_i32_0 = arith.constant 0 : i32
    %c0_i32_1 = arith.constant 0 : i32
    return %c0_i32, %c0_i32_0 : i32, i32
  }
  func.func @transform_3(%arg0: i32) -> (i32, i32) {
    %c0_i32 = arith.constant 0 : i32
    %c0_i32_0 = arith.constant 0 : i32
    %c0_i32_1 = arith.constant 0 : i32
    return %c0_i32, %c0_i32_0 : i32, i32
  }
  func.func @transform_4(%arg0: i32) -> (i32, i32) {
    %c0_i32 = arith.constant 0 : i32
    %c0_i32_0 = arith.constant 0 : i32
    %c0_i32_1 = arith.constant 0 : i32
    return %c0_i32, %c0_i32_0 : i32, i32
  }
  func.func @transform_5(%arg0: i32) -> (i32, i32) {
    %c0_i32 = arith.constant 0 : i32
    %c0_i32_0 = arith.constant 0 : i32
    %c0_i32_1 = arith.constant 0 : i32
    return %c0_i32, %c0_i32_0 : i32, i32
  }
  func.func @transform_6(%arg0: i32) -> (i32, i32) {
    %c0_i32 = arith.constant 0 : i32
    %c0_i32_0 = arith.constant 0 : i32
    return %arg0, %c0_i32 : i32, i32
  }
}

</mosaic_0001>

<bundles_post_ra>
// kernel: tpu_custom_call.1
= control target key start
LH: loop header
LB: loop body
LE: loop exit
PB: predicated region body
PF: predicated region fallthrough
CT: control target
= control target key end

     0   :  { %11 = vsyncpa [#allocation3], 0  ;;  %s472_s0 = inlined_call_operand.hbm [shape: f32[16,128], index: 0, kind: input, shape index: {}]   ;;  %s473_s1 = inlined_call_operand.hbm [shape: f32[128,128], index: 1, kind: input, shape index: {}]   ;;  %s474_s2 = inlined_call_operand.vmem [shape: f32[1,128], index: 2, kind: input, shape index: {}]   ;;  %s475_s3 = inlined_call_operand.hbm [shape: f32[128,128], index: 3, kind: input, shape index: {}]   ;;  %s476_s4 = inlined_call_operand.vmem [shape: f32[1,128], index: 4, kind: input, shape index: {}]   ;;  %s477_s5 = inlined_call_operand.hbm [shape: f32[128,128], index: 5, kind: input, shape index: {}]   ;;  %s478_s6 = inlined_call_operand.hbm [shape: f32[16,128], index: 6, kind: output, shape index: {}]  }
   0x1   :  { %12 = vsyncpa [#allocation6], 0 }
   0x2   :  { %13 = vsyncpa [#allocation9], 0 }
   0x3   :  { %14 = vsyncpa [#allocation4], 0  ;;  %s32_s23 = sshll.u32 %s473_s1, 4  ;;  %s394_s24 = smov [#allocation5]   ;;  %s33_s23 = int_to_ptr.hbm [resolvable:$true] %s32_s23 }
   0x4   :  { %s34_s25 = sshll.u32 %s394_s24, 4  ;;  %s19_s28 = sshll.u32 %s472_s0, 4  ;;  %s35_s25 = int_to_ptr.vmem [resolvable:$true] %s34_s25  ;;  %s20_s28 = int_to_ptr.hbm [resolvable:$true] %s19_s28 }
   0x5   :  { %s395_s29 = smov 128   ;;  %s396_s30 = smov 8  }
   0x6   :  { %40 = dma.hbm_to_vmem [thread:$0]  %s33_s23, 2048, %s35_s25, [#allocation6], %s395_s29, %s395_s29, %s396_s30  }
   0x7   :  { %s397_s7 = smov [#allocation2]   ;;  %s47_s1 = sshll.u32 %s475_s3, 4  ;;  %s48_s1 = int_to_ptr.hbm [resolvable:$true] %s47_s1 }
   0x8   :  { %s21_s8 = sshll.u32 %s397_s7, 4  ;;  %s62_s12 = sshll.u32 %s477_s5, 4  ;;  %s22_s8 = int_to_ptr.vmem [resolvable:$true] %s21_s8  ;;  %s63_s12 = int_to_ptr.hbm [resolvable:$true] %s62_s12 }
   0x9   :  { %27 = dma.hbm_to_vmem [thread:$0]  %s20_s28, 256, %s22_s8, [#allocation3], %s395_s29, %s395_s29, %s396_s30  }
   0xa   :  { %s398_s13 = smov [#allocation7]   ;;  %s399_s15 = smov [#allocation8]  }
   0xb   :  { %s49_s14 = sshll.u32 %s398_s13, 4  ;;  %s64_s3 = sshll.u32 %s399_s15, 4  ;;  %s50_s14 = int_to_ptr.vmem [resolvable:$true] %s49_s14  ;;  %s65_s3 = int_to_ptr.vmem [resolvable:$true] %s64_s3 }
   0xc   :  { %55 = dma.hbm_to_vmem [thread:$0]  %s48_s1, 2048, %s50_s14, [#allocation6], %s395_s29, %s395_s29, %s396_s30  }
   0xd   :  { %70 = dma.hbm_to_vmem [thread:$0]  %s63_s12, 2048, %s65_s3, [#allocation9], %s395_s29, %s395_s29, %s396_s30  }
   0xe   :  { %386 = dma.done.wait [#allocation3], 256  }
   0xf   :  { %387 = vsyncadd [#allocation3], 4294967040 }
  0x10   :  { %388 = dma.done.wait [#allocation6], 4096  }
  0x11   :  { %389 = vsyncadd [#allocation6], 4294963200 }
  0x12   :  { %390 = dma.done.wait [#allocation9], 2048  }
  0x13   :  { %391 = vsyncadd [#allocation9], 4294965248  ;;  %v106_v0 = vld [vmem:[#allocation5 + $0x78] sm:$0xff]  ;;  %v105_v1 = vld [vmem:[#allocation5 + $0x70] sm:$0xff]  ;;  %s226_s22 = sshll.u32 %s478_s6, 4  ;;  %s227_s22 = int_to_ptr.hbm [resolvable:$true] %s226_s22 }
  0x14   :  { %111 = vmatpush.msra.mxu0 %v106_v0  ;;  %241 = vmatpush.msra.mxu3 %v106_v0  ;;  %v104_v2 = vld [vmem:[#allocation5 + $0x68] sm:$0xff]  ;;  %v103_v3 = vld [vmem:[#allocation5 + $0x60] sm:$0xff]  ;;  %v102_v4 = vld [vmem:[#allocation5 + $0x58] sm:$0xff] }
  0x15   :  { %v194_v5 = vld [vmem:[#allocation8 + $0x78] sm:$0xff]  ;;  %v193_v7 = vld [vmem:[#allocation8 + $0x70] sm:$0xff]  ;;  %v192_v10 = vld [vmem:[#allocation8 + $0x68] sm:$0xff] }
  0x16   :  { %112 = vmatpush.msra.mxu0 %v105_v1  ;;  %242 = vmatpush.msra.mxu3 %v105_v1  ;;  %v151_v6 = vld [vmem:[#allocation7 + $0x78] sm:$0xff]  ;;  %v150_v8 = vld [vmem:[#allocation7 + $0x70] sm:$0xff]  ;;  %v149_v11 = vld [vmem:[#allocation7 + $0x68] sm:$0xff] }
  0x17   :  { %v101_v9 = vld [vmem:[#allocation5 + $0x50] sm:$0xff]  ;;  %195 = vmatpush.msra.mxu2 %v194_v5  ;;  %156 = vmatpush.msra.mxu1 %v151_v6  ;;  %v100_v12 = vld [vmem:[#allocation5 + $0x48] sm:$0xff]  ;;  %v191_v13 = vld [vmem:[#allocation8 + $0x60] sm:$0xff] }
  0x18   :  { %113 = vmatpush.msra.mxu0 %v104_v2  ;;  %243 = vmatpush.msra.mxu3 %v104_v2  ;;  %v148_v14 = vld [vmem:[#allocation7 + $0x60] sm:$0xff]  ;;  %v190_v16 = vld [vmem:[#allocation8 + $0x58] sm:$0xff]  ;;  %v189_v19 = vld [vmem:[#allocation8 + $0x50] sm:$0xff] }
  0x19   :  { %196 = vmatpush.msra.mxu2 %v193_v7  ;;  %157 = vmatpush.msra.mxu1 %v150_v8  ;;  %v99_v15 = vld [vmem:[#allocation5 + $0x40] sm:$0xff]  ;;  %v147_v17 = vld [vmem:[#allocation7 + $0x58] sm:$0xff]  ;;  %v146_v20 = vld [vmem:[#allocation7 + $0x50] sm:$0xff] }
  0x1a   :  { %114 = vmatpush.msra.mxu0 %v103_v3  ;;  %244 = vmatpush.msra.mxu3 %v103_v3  ;;  %v98_v18 = vld [vmem:[#allocation5 + $0x38] sm:$0xff]  ;;  %v97_v21 = vld [vmem:[#allocation5 + $0x30] sm:$0xff]  ;;  %v188_v22 = vld [vmem:[#allocation8 + $0x48] sm:$0xff] }
  0x1b   :  { %197 = vmatpush.msra.mxu2 %v192_v10  ;;  %158 = vmatpush.msra.mxu1 %v149_v11  ;;  %v145_v23 = vld [vmem:[#allocation7 + $0x48] sm:$0xff]  ;;  %v187_v25 = vld [vmem:[#allocation8 + $0x40] sm:$0xff]  ;;  %v186_v28 = vld [vmem:[#allocation8 + $0x38] sm:$0xff] }
  0x1c   :  { %115 = vmatpush.msra.mxu0 %v102_v4  ;;  %245 = vmatpush.msra.mxu3 %v102_v4  ;;  %v96_v24 = vld [vmem:[#allocation5 + $0x28] sm:$0xff]  ;;  %v144_v26 = vld [vmem:[#allocation7 + $0x40] sm:$0xff]  ;;  %v143_v29 = vld [vmem:[#allocation7 + $0x38] sm:$0xff] }
  0x1d   :  { %198 = vmatpush.msra.mxu2 %v191_v13  ;;  %159 = vmatpush.msra.mxu1 %v148_v14  ;;  %v95_v27 = vld [vmem:[#allocation5 + $0x20] sm:$0xff]  ;;  %v94_v30 = vld [vmem:[#allocation5 + $0x18] sm:$0xff]  ;;  %v185_v31 = vld [vmem:[#allocation8 + $0x30] sm:$0xff] }
  0x1e   :  { %116 = vmatpush.msra.mxu0 %v101_v9  ;;  %246 = vmatpush.msra.mxu3 %v101_v9  ;;  %v142_v32 = vld [vmem:[#allocation7 + $0x30] sm:$0xff]  ;;  %v88_v35 = vld [vmem:[#allocation2 + $0x8] sm:$0xff]  ;;  %v184_v36 = vld [vmem:[#allocation8 + $0x28] sm:$0xff] }
  0x1f   :  { %199 = vmatpush.msra.mxu2 %v190_v16  ;;  %160 = vmatpush.msra.mxu1 %v147_v17  ;;  %v93_v33 = vld [vmem:[#allocation5 + $0x10] sm:$0xff]  ;;  %v141_v37 = vld [vmem:[#allocation7 + $0x28] sm:$0xff]  ;;  %v183_v39 = vld [vmem:[#allocation8 + $0x20] sm:$0xff]  ;;  %v90_v43 = vmax.f32 %v88_v35, 0.0 }
  0x20   :  { %117 = vmatpush.msra.mxu0 %v100_v12  ;;  %247 = vmatpush.msra.mxu3 %v100_v12  ;;  %v87_v34 = vld [vmem:[#allocation2] sm:$0xff]  ;;  %v92_v38 = vld [vmem:[#allocation5 + $0x8] sm:$0xff]  ;;  %v140_v40 = vld [vmem:[#allocation7 + $0x20] sm:$0xff] }
  0x21   :  { %200 = vmatpush.msra.mxu2 %v189_v19  ;;  %161 = vmatpush.msra.mxu1 %v146_v20  ;;  %v91_v41 = vld [vmem:[#allocation5] sm:$0xff]  ;;  %v89_v42 = vmax.f32 %v87_v34, 0.0  ;;  %v182_v44 = vld [vmem:[#allocation8 + $0x18] sm:$0xff]  ;;  %v181_v46 = vld [vmem:[#allocation8 + $0x10] sm:$0xff] }
  0x22   :  { %118 = vmatpush.msra.mxu0 %v99_v15  ;;  %248 = vmatpush.msra.mxu3 %v99_v15  ;;  %v139_v45 = vld [vmem:[#allocation7 + $0x18] sm:$0xff]  ;;  %v180_v47 = vld [vmem:[#allocation8 + $0x8] sm:$0xff]  ;;  %v138_v48 = vld [vmem:[#allocation7 + $0x10] sm:$0xff] }
  0x23   :  { %201 = vmatpush.msra.mxu2 %v188_v22  ;;  %162 = vmatpush.msra.mxu1 %v145_v23  ;;  %v179_v49 = vld [vmem:[#allocation8] sm:$0xff]  ;;  %v137_v50 = vld [vmem:[#allocation7 + $0x8] sm:$0xff]  ;;  %v264_v52 = vld [vmem:[%s474_s2] ss:$0 sm:$0xff]  ;;  %s400_s2 = smov [#allocation10]  }
  0x24   :  { %119 = vmatpush.msra.mxu0 %v98_v18  ;;  %249 = vmatpush.msra.mxu3 %v98_v18  ;;  %v136_v51 = vld [vmem:[#allocation7] sm:$0xff]  ;;  %v265_v59 = vld [vmem:[%s476_s4] ss:$0 sm:$0xff]  ;;  %s224_s19 = sshll.u32 %s400_s2, 4  ;;  %s225_s19 = int_to_ptr.vmem [resolvable:$true] %s224_s19 }
  0x25   :  { %202 = vmatpush.msra.mxu2 %v187_v25  ;;  %163 = vmatpush.msra.mxu1 %v144_v26 }
  0x26   :  { %120 = vmatpush.msra.mxu0 %v97_v21  ;;  %250 = vmatpush.msra.mxu3 %v97_v21 }
  0x27   :  { %203 = vmatpush.msra.mxu2 %v186_v28  ;;  %164 = vmatpush.msra.mxu1 %v143_v29 }
  0x28   :  { %121 = vmatpush.msra.mxu0 %v96_v24  ;;  %251 = vmatpush.msra.mxu3 %v96_v24 }
  0x29   :  { %204 = vmatpush.msra.mxu2 %v185_v31  ;;  %165 = vmatpush.msra.mxu1 %v142_v32 }
  0x2a   :  { %122 = vmatpush.msra.mxu0 %v95_v27  ;;  %252 = vmatpush.msra.mxu3 %v95_v27 }
  0x2b   :  { %205 = vmatpush.msra.mxu2 %v184_v36  ;;  %166 = vmatpush.msra.mxu1 %v141_v37 }
  0x2c   :  { %123 = vmatpush.msra.mxu0 %v94_v30  ;;  %253 = vmatpush.msra.mxu3 %v94_v30 }
  0x2d   :  { %206 = vmatpush.msra.mxu2 %v183_v39  ;;  %167 = vmatpush.msra.mxu1 %v140_v40 }
  0x2e   :  { %124 = vmatpush.msra.mxu0 %v93_v33  ;;  %254 = vmatpush.msra.mxu3 %v93_v33 }
  0x2f   :  { %207 = vmatpush.msra.mxu2 %v182_v44  ;;  %168 = vmatpush.msra.mxu1 %v139_v45 }
  0x30   :  { %125 = vmatpush.msra.mxu0 %v92_v38  ;;  %255 = vmatpush.msra.mxu3 %v92_v38 }
  0x31   :  { %208 = vmatpush.msra.mxu2 %v181_v46  ;;  %169 = vmatpush.msra.mxu1 %v138_v48 }
  0x32   :  { %126 = vmatpush.msra.mxu0 %v91_v41  ;;  %256 = vmatpush.msra.mxu3 %v91_v41 }
  0x33   :  { %127 = vmatmul.f32.vlgmr.msra.gmra.mxu0 %v89_v42  ;;  %130 = vmatmul.f32.vlgmr.msra.gmra.mxu3 %v90_v43 }
  0x34   :  { %209 = vmatpush.msra.mxu2 %v180_v47  ;;  %170 = vmatpush.msra.mxu1 %v137_v50 }
  0x36   :  { %210 = vmatpush.msra.mxu2 %v179_v49  ;;  %171 = vmatpush.msra.mxu1 %v136_v51 }
  0x37   :  { %211 = vmatmul.f32.vlgmr.msra.gmra.mxu2 %v87_v34 }
  0x3f   :  { %214 = vmatmul.f32.gmra.mxu2 %v88_v35 }
  0xb0   :  { %v128_v53 = vpop.f32.mrf.mxu0 }
  0xb1   :  { %v129_v54 = vadd.f32 %v264_v52, %v128_v53 }
  0xb3   :  { %v134_v55 = vmax.f32 %v129_v54, 0.0 }
  0xb5   :  { %172 = vmatmul.f32.vlgmr.msra.gmra.mxu1 %v134_v55 }
  0xb6   :  { %v131_v56 = vpop.f32.mrf.mxu3 }
  0xb7   :  { %v132_v57 = vadd.f32 %v264_v52, %v131_v56 }
  0xb9   :  { %v135_v58 = vmax.f32 %v132_v57, 0.0 }
  0xba   :  { %v212_v60 = vpop.f32.mrf.mxu2 }
  0xbd   :  { %175 = vmatmul.f32.gmra.mxu1 %v135_v58 }
  0xc2   :  { %v215_v1 = vpop.f32.mrf.mxu2 }
 0x132   :  { %v173_v61 = vpop.f32.mrf.mxu1 }
 0x133   :  { %v174_v62 = vadd.f32 %v265_v59, %v173_v61 }
 0x135   :  { %v213_v63 = vadd.f32 %v212_v60, %v174_v62 }
 0x137   :  { %218 = vst [vmem:[#allocation10] sm:$0xff] %v213_v63 }
 0x13a   :  { %v176_v0 = vpop.f32.mrf.mxu1 }
 0x13b   :  { %v177_v2 = vadd.f32 %v265_v59, %v176_v0 }
 0x13d   :  { %v216_v3 = vadd.f32 %v215_v1, %v177_v2 }
 0x13f   :  { %219 = vst [vmem:[#allocation10 + $0x8] sm:$0xff] %v216_v3 }
 0x140   :  { %232 = dma.vmem_to_hbm [thread:$0]  %s225_s19, 256, %s227_s22, [#allocation4], %s395_s29, %s395_s29, %s396_s30  }
 0x141   :  { %392 = dma.done.wait [#allocation4], 256  }
 0x142   :  { %393 = vsyncadd [#allocation4], 4294967040 }
 0x143   :  { %237 = vsyncpa [#allocation3], 1 }
 0x144   :  { %238 = vsyncpa [#allocation6], 1 }
 0x145   :  { %239 = vsyncpa [#allocation9], 1 }
 0x146   :  { %240 = vsyncpa [#allocation4], 1 }

</bundles_post_ra>
